<compile_context>
chip_gen: v5e
topology: v5e:2x2
jax: 0.10.0
libtpu: 0.0.40
codegen_flags: <defaults>
</compile_context>

<pallas_src>
import functools

import numpy as np
import jax
import jax.numpy as jnp
from jax.experimental import pallas as pl
from jax.experimental.pallas import tpu as pltpu

_TOKEN_TILE = 512          # tokens per grid step == MXU contraction dim
_G_SLAB = 256              # node-axis slab (keeps (G, T) one-hot in vregs)


def _round_up(x, m):
    return ((x + m - 1) // m) * m


def _scatter_agg_kernel(idx_ref, emb_ref, out_ref, acc_ref, cnt_ref, *,
                        mean, n_tokens, g_slab, n_slabs):
    """acc[g, :] += sum_t one_hot(idx)[g, t] * emb[t, :]  (MXU, token axis = K).

    grid = (hidden tiles [parallel], token tiles [reduction]).  acc_ref/cnt_ref
    are resident f32 VMEM scratch; out_ref is written once, on the last token
    step, already cast to the output dtype.
    """
    t = pl.program_id(1)
    T = emb_ref.shape[0]

    @pl.when(t == 0)
    def _():
        acc_ref[...] = jnp.zeros_like(acc_ref)
        if mean:
            cnt_ref[...] = jnp.zeros_like(cnt_ref)

    idx = idx_ref[0]                       # (1, T) int32; padded entries are -1
    emb = emb_ref[...]                     # (T, TH)

    if n_tokens % T != 0:
        # Ragged tail tile: rows past n_tokens are undefined (no wrapper pad).
        # Zero them so 0 * NaN can't propagate through the MXU.  idx is padded
        # with -1 already, so the one-hot / counts need no extra masking.
        row = jax.lax.broadcasted_iota(jnp.int32, (T, 1), 0)
        emb = jnp.where(t * T + row < n_tokens, emb, jnp.zeros_like(emb))

    def slab_update(g0):
        # one_hot[g, t] = 1 iff token t maps to node g (nodes on sublanes,
        # tokens lane-dense -> natural MXU orientation).
        node_iota = g0 + jax.lax.broadcasted_iota(jnp.int32, (g_slab, T), 0)
        mask = node_iota == idx            # (g_slab, T); -1 matches nothing
        one_hot = mask.astype(emb.dtype)
        # MXU: (g_slab, T) @ (T, TH) -> (g_slab, TH), f32 accumulation.
        acc_ref[pl.ds(g0, g_slab), :] += jax.lax.dot_general(
            one_hot, emb, (((1,), (0,)), ((), ())),
            preferred_element_type=jnp.float32)
        if mean:
            # Per-node token counts via a cross-lane reduce (XLU slot).
            cnt_ref[pl.ds(g0, g_slab), :] += jnp.sum(
                mask.astype(jnp.float32), axis=1, keepdims=True)

    if n_slabs == 1:
        slab_update(0)
    else:
        def body(s, carry):
            slab_update(pl.multiple_of(s * g_slab, g_slab))
            return carry
        jax.lax.fori_loop(0, n_slabs, body, 0, unroll=n_slabs <= 8)

    @pl.when(t == pl.num_programs(1) - 1)
    def _():
        if mean:
            inv = pl.reciprocal(jnp.maximum(cnt_ref[...], 1.0))   # exact
            out_ref[...] = (acc_ref[...] * inv).astype(out_ref.dtype)
        else:
            out_ref[...] = acc_ref[...].astype(out_ref.dtype)


def _vmem_capacity_bytes():
    try:
        return int(pltpu.get_tpu_info().vmem_capacity_bytes)
    except Exception:
        return 64 * 1024 * 1024      # conservative (v7x-sized) fallback


def _pick_hidden_tile(H, G_pad, emb_isize, out_isize, token_tile, nbuf_emb,
                      budget_bytes, force_even_tiles):
    """Largest lane-aligned hidden tile whose resident accumulator + output
    block + multi-buffered emb tiles fit the generation-aware VMEM budget."""
    if H % 128 != 0:
        return H                     # small / odd H: one full-width tile

    def need(th):
        return (G_pad * th * 4                     # f32 accumulator scratch
                + 2 * G_pad * th * out_isize       # double-buffered output block
                + nbuf_emb * token_tile * th * emb_isize)

    th = H
    while th % 256 == 0 and th > 128 and need(th) > budget_bytes:
        th //= 2
    if force_even_tiles:
        # 2 TensorCores share the "parallel" hidden axis: make H // TH even >= 2.
        while (H // th) % 2 != 0 and th % 256 == 0 and th > 128:
            th //= 2
    return th


def token_to_node_aggregate(token_embeddings, token_to_node, aggregation="mean",
                            num_nodes=None):
    """JAX/Pallas equivalent of TokenToNodeAggregator.forward ('mean'/'sum').

    Pass `num_nodes` as a static int when jitting; if None it is derived from
    token_to_node (device->host sync, same semantics as torch int(index.max())+1).
    """
    if aggregation not in ("mean", "sum"):
        # TODO(synk): 'max' and 'attention' aggregation modes not implemented.
        raise NotImplementedError(f"aggregation={aggregation!r} not supported")

    B, S, H = token_embeddings.shape
    if num_nodes is None:
        num_nodes = int(jax.device_get(jnp.max(token_to_node))) + 1

    in_dtype = jnp.dtype(token_embeddings.dtype)
    # bf16 stays bf16 on the MXU (2x throughput, half the HBM/VMEM traffic);
    # the one-hot is exactly representable and accumulation stays f32.
    if in_dtype in (jnp.dtype(jnp.bfloat16), jnp.dtype(jnp.float32)):
        emb_dtype = in_dtype
    else:
        emb_dtype = jnp.dtype(jnp.float32)
    out_dtype = emb_dtype
    out_isize = jnp.dtype(out_dtype).itemsize

    N = B * S
    token_tile = _TOKEN_TILE if N >= _TOKEN_TILE else _round_up(N, 8)
    n_tiles = (N + token_tile - 1) // token_tile

    # Node axis lives on sublanes; chunk it into <=256-row slabs when large.
    G_pad = _round_up(num_nodes, 16)
    if G_pad > _G_SLAB:
        G_pad = _round_up(G_pad, _G_SLAB)
        g_slab = _G_SLAB
    else:
        g_slab = G_pad
    n_slabs = G_pad // g_slab

    # Extra pipeline depth only helps in the DMA-bound small-node regime.
    nbuf_emb = 3 if (G_pad <= 128 and n_tiles >= 4) else 2

    vmem_cap = _vmem_capacity_bytes()
    two_cores = vmem_cap <= 64 * 1024 * 1024          # v7x-sized part -> 2 TCs
    budget = max(min(40 * 1024 * 1024, vmem_cap // 2 - 8 * 1024 * 1024),
                 8 * 1024 * 1024)

    # NO pad / copy of the big activation tensor: reshape only (+ cast only if
    # the dtype is neither f32 nor bf16).
    emb = token_embeddings.reshape(N, H)
    if emb.dtype != emb_dtype:
        emb = emb.astype(emb_dtype)
    idx = token_to_node.reshape(N).astype(jnp.int32)
    idx = jnp.pad(idx, (0, n_tiles * token_tile - N), constant_values=-1)
    idx = idx.reshape(n_tiles, 1, token_tile)          # lane-dense token-id rows

    TH = _pick_hidden_tile(H, G_pad, emb.dtype.itemsize, out_isize,
                           token_tile, nbuf_emb, budget, two_cores)

    vmem_need = (G_pad * TH * 4                         # acc scratch
                 + 2 * G_pad * TH * out_isize           # out block (dbuf)
                 + nbuf_emb * token_tile * TH * emb.dtype.itemsize
                 + 2 * token_tile * 4                   # idx blocks
                 + G_pad * 128 * 4)                     # cnt scratch (lane pad)
    vmem_limit = int(min(max(2 * vmem_need, 32 * 1024 * 1024),
                         vmem_cap - 8 * 1024 * 1024))

    emb_spec_kwargs = {}
    if nbuf_emb == 3:
        emb_spec_kwargs["pipeline_mode"] = pl.Buffered(3)

    kernel = functools.partial(_scatter_agg_kernel, mean=(aggregation == "mean"),
                               n_tokens=N, g_slab=g_slab, n_slabs=n_slabs)

    node_flat = pl.pallas_call(
        kernel,
        out_shape=jax.ShapeDtypeStruct((G_pad, H), out_dtype),
        grid_spec=pltpu.PrefetchScalarGridSpec(
            num_scalar_prefetch=0,
            grid=(H // TH, n_tiles),                    # (parallel hidden, token reduce)
            in_specs=[
                pl.BlockSpec((1, 1, token_tile), lambda h, t: (t, 0, 0)),  # token ids
                pl.BlockSpec((token_tile, TH), lambda h, t: (t, h),        # embeddings
                             **emb_spec_kwargs),
            ],
            out_specs=pl.BlockSpec((G_pad, TH), lambda h, t: (0, h)),
            scratch_shapes=[pltpu.VMEM((G_pad, TH), jnp.float32),          # f32 acc
                            pltpu.VMEM((G_pad, 1), jnp.float32)],          # counts
        ),
        compiler_params=pltpu.CompilerParams(
            dimension_semantics=("parallel", "arbitrary"),
            vmem_limit_bytes=vmem_limit),
    )(idx, emb)

    node = node_flat[:num_nodes].reshape(B, -1, H)     # matches torch .view(B, -1, H)
    if jnp.issubdtype(in_dtype, jnp.floating) and node.dtype != in_dtype:
        node = node.astype(in_dtype)
    return node


def _reference(token_embeddings, token_to_node, aggregation, num_nodes):
    """Pure-JAX reference matching the PyTorch scatter_mean / scatter_sum path."""
    B, S, H = token_embeddings.shape
    emb = token_embeddings.reshape(-1, H).astype(jnp.float32)
    idx = token_to_node.reshape(-1)
    sums = jax.ops.segment_sum(emb, idx, num_segments=num_nodes)
    if aggregation == "sum":
        return sums.reshape(B, -1, H)
    cnts = jax.ops.segment_sum(jnp.ones_like(idx, dtype=jnp.float32), idx,
                               num_segments=num_nodes)
    return (sums / jnp.maximum(cnts, 1.0)[:, None]).reshape(B, -1, H)


if __name__ == "__main__":
    key = jax.random.PRNGKey(0)
    k_emb, k_idx = jax.random.split(key)

    # --- small shape (module layout: [batch, seq, hidden]) --------------------
    B, S, H = 2, 8, 32
    num_nodes = 6                         # divisible by B so .view(B, -1, H) is valid
    token_embeddings = jax.random.normal(k_emb, (B, S, H), dtype=jnp.float32)
    token_to_node = jax.random.randint(k_idx, (B, S), 0, num_nodes, dtype=jnp.int32)
    token_to_node = token_to_node.at[0, 0].set(num_nodes - 1)   # max id appears

    out_mean = jax.block_until_ready(
        token_to_node_aggregate(token_embeddings, token_to_node, "mean",
                                num_nodes=num_nodes))
    ref_mean = _reference(token_embeddings, token_to_node, "mean", num_nodes)
    assert out_mean.shape == ref_mean.shape == (B, num_nodes // B, H)
    np.testing.assert_allclose(np.asarray(out_mean), np.asarray(ref_mean),
                               rtol=1e-5, atol=1e-5)

    out_sum = jax.block_until_ready(
        token_to_node_aggregate(token_embeddings, token_to_node, "sum",
                                num_nodes=num_nodes))
    ref_sum = _reference(token_embeddings, token_to_node, "sum", num_nodes)
    np.testing.assert_allclose(np.asarray(out_sum), np.asarray(ref_sum),
                               rtol=1e-5, atol=1e-5)

    # --- ragged multi-tile shape (exercises the in-kernel tail masking) -------
    B2, S2, H2 = 2, 333, 256              # N = 666 -> two 512-token tiles, ragged tail
    num_nodes2 = 10
    emb2 = jax.random.normal(k_emb, (B2, S2, H2), dtype=jnp.float32)
    idx2 = jax.random.randint(k_idx, (B2, S2), 0, num_nodes2, dtype=jnp.int32)
    idx2 = idx2.at[0, 0].set(num_nodes2 - 1)

    out2 = jax.block_until_ready(
        token_to_node_aggregate(emb2, idx2, "mean", num_nodes=num_nodes2))
    ref2 = _reference(emb2, idx2, "mean", num_nodes2)
    np.testing.assert_allclose(np.asarray(out2), np.asarray(ref2),
                               rtol=1e-5, atol=1e-4)

    print("KERNEL_OK")
</pallas_src>

<mosaic_0001>
module attributes {stable_mosaic.version = 11 : i64} {
  func.func @_scatter_agg_kernel(%arg0: i32, %arg1: i32, %arg2: memref<1x1x16xi32, #tpu.memory_space<vmem>>, %arg3: memref<16x32xf32, #tpu.memory_space<vmem>>, %arg4: memref<16x32xf32, #tpu.memory_space<vmem>>, %arg5: memref<16x32xf32, #tpu.memory_space<vmem>>, %arg6: memref<16x1xf32, #tpu.memory_space<vmem>>) attributes {dimension_semantics = [#tpu.dimension_semantics<parallel>, #tpu.dimension_semantics<arbitrary>], iteration_bounds = array<i64: 1, 1>, scalar_prefetch = 0 : i64, scratch_operands = 2 : i64, tpu.core_type = #tpu.core_type<tc>, window_params = [{transform_indices = @transform_0, window_bounds = array<i64: 1, 1, 16>}, {transform_indices = @transform_1, window_bounds = array<i64: 16, 32>}, {transform_indices = @transform_2, window_bounds = array<i64: 16, 32>}]} {
    %c0_i32 = arith.constant 0 : i32
    %0 = arith.cmpi eq, %arg1, %c0_i32 : i32
    %1 = arith.extui %0 : i1 to i32
    %c0_i32_0 = arith.constant 0 : i32
    %2 = arith.cmpi ne, %1, %c0_i32_0 : i32
    scf.if %2 {
      %cst_17 = arith.constant 0.000000e+00 : f32
      %27 = vector.broadcast %cst_17 : f32 to vector<16x32xf32>
      %c0_18 = arith.constant 0 : index
      %c0_19 = arith.constant 0 : index
      %28 = vector.load %arg5[%c0_18, %c0_19] : memref<16x32xf32, #tpu.memory_space<vmem>>, vector<16x32xf32>
      tpu.vector_store %arg5[%c0_18, %c0_19], %27 {strides = array<i32>} : memref<16x32xf32, #tpu.memory_space<vmem>>, vector<16x32xf32>,
      %cst_20 = arith.constant 0.000000e+00 : f32
      %29 = vector.broadcast %cst_20 : f32 to vector<16x1xf32>
      %c0_21 = arith.constant 0 : index
      %c0_22 = arith.constant 0 : index
      %30 = vector.load %arg6[%c0_21, %c0_22] : memref<16x1xf32, #tpu.memory_space<vmem>>, vector<16x1xf32>
      tpu.vector_store %arg6[%c0_21, %c0_22], %29 {strides = array<i32>} : memref<16x1xf32, #tpu.memory_space<vmem>>, vector<16x1xf32>,
    } else {
    }
    %c0 = arith.constant 0 : index
    %c0_1 = arith.constant 0 : index
    %c0_2 = arith.constant 0 : index
    %3 = vector.load %arg2[%c0, %c0_1, %c0_2] : memref<1x1x16xi32, #tpu.memory_space<vmem>>, vector<1x1x16xi32>
    %4 = vector.shape_cast %3 : vector<1x1x16xi32> to vector<1x16xi32>
    %c0_3 = arith.constant 0 : index
    %c0_4 = arith.constant 0 : index
    %5 = vector.load %arg3[%c0_3, %c0_4] : memref<16x32xf32, #tpu.memory_space<vmem>>, vector<16x32xf32>
    %6 = tpu.iota {dimensions = array<i32: 0>} : vector<16x16xi32>
    %c0_i32_5 = arith.constant 0 : i32
    %7 = vector.broadcast %c0_i32_5 : i32 to vector<16x16xi32>
    %8 = arith.addi %7, %6 : vector<16x16xi32>
    %9 = vector.broadcast %4 : vector<1x16xi32> to vector<16x16xi32>
    %10 = arith.cmpi eq, %8, %9 : vector<16x16xi32>
    %11 = arith.extui %10 : vector<16x16xi1> to vector<16x16xi32>
    %12 = arith.sitofp %11 : vector<16x16xi32> to vector<16x16xf32>
    %c0_6 = arith.constant 0 : index
    %c0_7 = arith.constant 0 : index
    %13 = vector.load %arg5[%c0_6, %c0_7] : memref<16x32xf32, #tpu.memory_space<vmem>>, vector<16x32xf32>
    %cst = arith.constant dense<0.000000e+00> : vector<16x32xf32>
    %14 = tpu.matmul %12, %5, %cst {dimension_numbers = #tpu.dot_dimension_numbers<[1], [0], [0], [1], [0, 0, 1, 1], [], []>} : vector<16x16xf32>, vector<16x32xf32>, vector<16x32xf32> -> vector<16x32xf32>
    %15 = arith.addf %13, %14 : vector<16x32xf32>
    %c0_8 = arith.constant 0 : index
    %c0_9 = arith.constant 0 : index
    %16 = vector.load %arg5[%c0_8, %c0_9] : memref<16x32xf32, #tpu.memory_space<vmem>>, vector<16x32xf32>
    tpu.vector_store %arg5[%c0_8, %c0_9], %15 {strides = array<i32>} : memref<16x32xf32, #tpu.memory_space<vmem>>, vector<16x32xf32>,
    %c0_10 = arith.constant 0 : index
    %c0_11 = arith.constant 0 : index
    %17 = vector.load %arg6[%c0_10, %c0_11] : memref<16x1xf32, #tpu.memory_space<vmem>>, vector<16x1xf32>
    %18 = arith.extui %10 : vector<16x16xi1> to vector<16x16xi32>
    %19 = arith.sitofp %18 : vector<16x16xi32> to vector<16x16xf32>
    %cst_12 = arith.constant dense<0.000000e+00> : vector<16xf32>
    %20 = vector.multi_reduction <add>, %19, %cst_12 [1] : vector<16x16xf32> to vector<16xf32>
    %21 = vector.shape_cast %20 : vector<16xf32> to vector<16x1xf32>
    %22 = arith.addf %17, %21 : vector<16x1xf32>
    %c0_13 = arith.constant 0 : index
    %c0_14 = arith.constant 0 : index
    %23 = vector.load %arg6[%c0_13, %c0_14] : memref<16x1xf32, #tpu.memory_space<vmem>>, vector<16x1xf32>
    tpu.vector_store %arg6[%c0_13, %c0_14], %22 {strides = array<i32>} : memref<16x1xf32, #tpu.memory_space<vmem>>, vector<16x1xf32>,
    %c0_i32_15 = arith.constant 0 : i32
    %24 = arith.cmpi eq, %arg1, %c0_i32_15 : i32
    %25 = arith.extui %24 : i1 to i32
    %c0_i32_16 = arith.constant 0 : i32
    %26 = arith.cmpi ne, %25, %c0_i32_16 : i32
    scf.if %26 {
      %c0_17 = arith.constant 0 : index
      %c0_18 = arith.constant 0 : index
      %27 = vector.load %arg6[%c0_17, %c0_18] : memref<16x1xf32, #tpu.memory_space<vmem>>, vector<16x1xf32>
      %cst_19 = arith.constant 1.000000e+00 : f32
      %28 = vector.broadcast %cst_19 : f32 to vector<16x1xf32>
      %29 = arith.maximumf %27, %28 : vector<16x1xf32>
      %30 = tpu.reciprocal %29 : vector<16x1xf32> -> vector<16x1xf32>
      %c0_20 = arith.constant 0 : index
      %c0_21 = arith.constant 0 : index
      %31 = vector.load %arg5[%c0_20, %c0_21] : memref<16x32xf32, #tpu.memory_space<vmem>>, vector<16x32xf32>
      %32 = vector.broadcast %30 : vector<16x1xf32> to vector<16x32xf32>
      %33 = arith.mulf %31, %32 : vector<16x32xf32>
      %c0_22 = arith.constant 0 : index
      %c0_23 = arith.constant 0 : index
      %34 = vector.load %arg4[%c0_22, %c0_23] : memref<16x32xf32, #tpu.memory_space<vmem>>, vector<16x32xf32>
      tpu.vector_store %arg4[%c0_22, %c0_23], %33 {strides = array<i32>} : memref<16x32xf32, #tpu.memory_space<vmem>>, vector<16x32xf32>,
    } else {
    }
    return
  }
  func.func @transform_0(%arg0: i32, %arg1: i32) -> (i32, i32, i32) {
    %c0_i32 = arith.constant 0 : i32
    %c0_i32_0 = arith.constant 0 : i32
    %c0_i32_1 = arith.constant 0 : i32
    return %arg1, %c0_i32, %c0_i32_0 : i32, i32, i32
  }
  func.func @transform_1(%arg0: i32, %arg1: i32) -> (i32, i32) {
    %c0_i32 = arith.constant 0 : i32
    return %arg1, %arg0 : i32, i32
  }
  func.func @transform_2(%arg0: i32, %arg1: i32) -> (i32, i32) {
    %c0_i32 = arith.constant 0 : i32
    %c0_i32_0 = arith.constant 0 : i32
    return %c0_i32, %arg0 : i32, i32
  }
}

</mosaic_0001>

<bundles_post_ra>
// kernel: tpu_custom_call.1
= control target key start
LH: loop header
LB: loop body
LE: loop exit
PB: predicated region body
PF: predicated region fallthrough
CT: control target
= control target key end

     0   :  { %7 = vsyncpa [#allocation5], 0  ;;  %s335_s0 = inlined_call_operand.hbm [shape: s32[1,1,16], index: 0, kind: input, shape index: {}]   ;;  %s336_s1 = inlined_call_operand.hbm [shape: f32[16,32], index: 1, kind: input, shape index: {}]   ;;  %s337_s2 = inlined_call_operand.hbm [shape: f32[16,32], index: 2, kind: output, shape index: {}]  }
   0x1   :  { %8 = vsyncpa [#allocation8], 0 }
   0x2   :  { %9 = vsyncpa [#allocation6], 0  ;;  %s15_s11 = sshll.u32 %s335_s0, 4  ;;  %s284_s12 = smov [#allocation4]   ;;  %s16_s11 = int_to_ptr.hbm [resolvable:$true] %s15_s11 }
   0x3   :  { %s17_s13 = sshll.u32 %s284_s12, 4  ;;  %s25_s16 = sshll.u32 %s336_s1, 4  ;;  %s18_s13 = int_to_ptr.vmem [resolvable:$true] %s17_s13  ;;  %s26_s16 = int_to_ptr.hbm [resolvable:$true] %s25_s16 }
   0x4   :  { %20 = dma.hbm_to_vmem [thread:$0]  %s16_s11, 16, %s18_s13, [#allocation5]  }
   0x5   :  { %s285_s17 = smov [#allocation7]   ;;  %s286_s19 = smov 128  }
   0x6   :  { %s27_s18 = sshll.u32 %s285_s17, 4  ;;  %s287_s20 = smov 8   ;;  %s28_s18 = int_to_ptr.vmem [resolvable:$true] %s27_s18 }
   0x7   :  { %33 = dma.hbm_to_vmem [thread:$0]  %s26_s16, 256, %s28_s18, [#allocation8], %s286_s19, %s286_s19, %s287_s20  }
   0x8   :  { %278 = dma.done.wait [#allocation5], 16  }
   0x9   :  { %279 = vsyncadd [#allocation5], 4294967280 }
   0xa   :  { %280 = dma.done.wait [#allocation8], 256  }
   0xb   :  { %281 = vsyncadd [#allocation8], 4294967040  ;;  %vm49_vm0 = vcmask 7168   ;;  %v55_v0 = vlaneseq  ;;  %v288_v1 = vmov 0.0   ;;  %v201_v3 = vld [vmem:[#allocation4] ss:$0 sm:$0xff] }
   0xc   :  { %50 = vst.msk [vmem:[#allocation3] sm:$0xff] %vm49_vm0, %v288_v1  ;;  %vm67_vm1 = vcmask 130048   ;;  %v54_v9 = vld [vmem:[#allocation7 + $0x8] sm:$0xff]  ;;  %v53_v10 = vld [vmem:[#allocation7] sm:$0xff]  ;;  %v289_v11 = vmov 0   ;;  %vm46_vm4 = vcmask 261120  }
   0xd   :  { %51 = vst.msk [vmem:[#allocation3 + $0x8] sm:$0xff] %vm49_vm0, %v288_v1  ;;  %v56_v2 = vshrl.u32 %v55_v0, 7  ;;  %88 = vmatpush.msra.mxu0 %v54_v9  ;;  %190 = vmatpush.msra.mxu1 %v54_v9  ;;  %s290_s0 = smov [#allocation9]   ;;  %s172_s23 = sshll.u32 %s337_s2, 4  ;;  %s173_s23 = int_to_ptr.hbm [resolvable:$true] %s172_s23 }
   0xe   :  { %199 = vset.pattern.permute.xlu1 %v289_v11  ;;  %200 = vset.pattern.permute.xlu0 %v289_v11  ;;  %47 = vst.msk [vmem:[#allocation2] sm:$0xff] %vm46_vm4, %v288_v1  ;;  %s170_s1 = sshll.u32 %s290_s0, 4  ;;  %s171_s1 = int_to_ptr.vmem [resolvable:$true] %s170_s1 }
   0xf   :  { %v57_v4 = vadd.s32 8, %v56_v2  ;;  %vm59_vm2 = vcmp.eq.s32.totalorder %v56_v2, %v201_v3  ;;  %89 = vmatpush.msra.mxu0 %v53_v10  ;;  %191 = vmatpush.msra.mxu1 %v53_v10  ;;  %48 = vst.msk [vmem:[#allocation2 + $0x8] sm:$0xff] %vm46_vm4, %v288_v1 }
  0x10   :  { %v186_v5 = vsel %vm59_vm2, 1.0, %v288_v1 }
  0x11   :  { %v104_v6 = vsel %vm67_vm1, %v186_v5, 0.0  ;;  %vm60_vm3 = vcmp.eq.s32.totalorder %v57_v4, %v201_v3  ;;  %188 = vmatmul.msk.f32.vlgmr.msra.gmra.mxu0 %vm67_vm1, %v186_v5 }
  0x12   :  { %105 = vadd.xlane.f32.xlu0 %v104_v6  ;;  %v187_v7 = vsel %vm60_vm3, 1.0, %v288_v1 }
  0x13   :  { %v107_v8 = vsel %vm67_vm1, %v187_v7, 0.0  ;;  %189 = vmatmul.msk.f32.vlgmr.msra.gmra.mxu1 %vm67_vm1, %v187_v7  ;;  %v102_v12 = vld [vmem:[#allocation3] sm:$0xff] }
  0x14   :  { %v103_v15 = vld [vmem:[#allocation3 + $0x8] sm:$0xff] }
  0x15   :  { %v65_v42 = vld [vmem:[#allocation2] sm:$0xff] }
  0x16   :  { %v66_v43 = vld [vmem:[#allocation2 + $0x8] sm:$0xff] }
  0x1a   :  { %108 = vadd.xlane.f32.xlu0 %v107_v8 }
  0x85   :  { %v106_v13 = vpop.xlane.xlu0 %105 }
  0x86   :  { %v110_v14 = vadd.f32 %v106_v13, %v102_v12 }
  0x88   :  { %113 = vst.msk [vmem:[#allocation3] sm:$0xff] %vm49_vm0, %v110_v14 }
  0x8d   :  { %v109_v16 = vpop.xlane.xlu0 %108 }
  0x8e   :  { %v111_v17 = vadd.f32 %v109_v16, %v103_v15  ;;  %v91_v44 = vpop.f32.mrf.mxu0 }
  0x8f   :  { %v118_v18 = vld [vmem:[#allocation3] sm:$0xff]  ;;  %v97_v46 = vadd.f32 %v91_v44, %v65_v42 }
  0x90   :  { %114 = vst.msk [vmem:[#allocation3 + $0x8] sm:$0xff] %vm49_vm0, %v111_v17  ;;  %v120_v19 = vmax.f32 %v118_v18, 1.0  ;;  %v94_v45 = vpop.f32.mrf.mxu1 }
  0x91   :  { %v98_v47 = vadd.f32 %v94_v45, %v66_v43  ;;  %100 = vst.msk [vmem:[#allocation2] sm:$0xff] %vm46_vm4, %v97_v46 }
  0x92   :  { %202 = vrcp.f32 %v120_v19  ;;  %v133_v25 = vand.u32 2147483648, %v120_v19  ;;  %v131_v27 = vand.u32 2147483647, %v120_v19  ;;  %vm127_vm6 = vweird.f32 %v120_v19 }
  0x93   :  { %101 = vst.msk [vmem:[#allocation2 + $0x8] sm:$0xff] %vm46_vm4, %v98_v47 }
  0x94   :  { %v134_v30 = vor.u32 1.1754944e-38, %v133_v25  ;;  %vm132_vm8 = vcmp.eq.f32.partialorder %v131_v27, 8.507059e+37 }
  0x97   :  { %v119_v20 = vld [vmem:[#allocation3 + $0x8] sm:$0xff] }
  0x98   :  { %v203_v21 = vpop.eup %202  ;;  %v121_v22 = vmax.f32 %v119_v20, 1.0  ;;  %v150_v48 = vld [vmem:[#allocation2] sm:$0xff] }
  0x99   :  { %v123_v23 = vmul.f32 %v203_v21, %v120_v19  ;;  %vm128_vm5 = vweird.f32 %v203_v21 }
  0x9a   :  { %204 = vrcp.f32 %v121_v22  ;;  %vm129_vm7 = vmor %vm127_vm6, %vm128_vm5  ;;  %v147_v35 = vand.u32 2147483648, %v121_v22  ;;  %v145_v37 = vand.u32 2147483647, %v121_v22  ;;  %vm141_vm10 = vweird.f32 %v121_v22  ;;  %v151_v51 = vld [vmem:[#allocation2 + $0x8] sm:$0xff] }
  0x9b   :  { %v124_v24 = vsub.f32 1.0, %v123_v23 }
  0x9c   :  { %v148_v39 = vor.u32 1.1754944e-38, %v147_v35  ;;  %vm146_vm12 = vcmp.eq.f32.partialorder %v145_v37, 8.507059e+37 }
  0x9d   :  { %v125_v26 = vmul.f32 %v203_v21, %v124_v24 }
  0x9f   :  { %v126_v28 = vadd.f32 %v203_v21, %v125_v26 }
  0xa0   :  { %v205_v29 = vpop.eup %204 }
  0xa1   :  { %v130_v31 = vsel %vm129_vm7, %v203_v21, %v126_v28  ;;  %v137_v32 = vmul.f32 %v205_v29, %v121_v22  ;;  %vm142_vm9 = vweird.f32 %v205_v29 }
  0xa2   :  { %v135_v33 = vsel %vm132_vm8, %v134_v30, %v130_v31  ;;  %vm143_vm11 = vmor %vm141_vm10, %vm142_vm9 }
  0xa3   :  { %154 = vperm.xlu1 %199, %v135_v33   ;;  %v138_v34 = vsub.f32 1.0, %v137_v32 }
  0xa5   :  { %v139_v36 = vmul.f32 %v205_v29, %v138_v34 }
  0xa7   :  { %v140_v38 = vadd.f32 %v205_v29, %v139_v36 }
  0xa9   :  { %v144_v40 = vsel %vm143_vm11, %v205_v29, %v140_v38 }
  0xaa   :  { %v149_v41 = vsel %vm146_vm12, %v148_v39, %v144_v40 }
  0xab   :  { %159 = vperm.xlu1 %199, %v149_v41  }
 0x115   :  { %v155_v49 = vpop.permute.xlu1 %154 }
 0x116   :  { %v162_v50 = vmul.f32 %v155_v49, %v150_v48 }
 0x118   :  { %164 = vst.msk [vmem:[#allocation9] sm:$0xff] %vm46_vm4, %v162_v50 }
 0x11d   :  { %v160_v52 = vpop.permute.xlu1 %159 }
 0x11e   :  { %v163_v53 = vmul.f32 %v160_v52, %v151_v51 }
 0x120   :  { %165 = vst.msk [vmem:[#allocation9 + $0x8] sm:$0xff] %vm46_vm4, %v163_v53 }
 0x121   :  { %178 = dma.vmem_to_hbm [thread:$0]  %s171_s1, 256, %s173_s23, [#allocation6], %s286_s19, %s286_s19, %s287_s20  }
 0x122   :  { %282 = dma.done.wait [#allocation6], 256  }
 0x123   :  { %283 = vsyncadd [#allocation6], 4294967040 }
 0x124   :  { %183 = vsyncpa [#allocation5], 1 }
 0x125   :  { %184 = vsyncpa [#allocation8], 1 }
 0x126   :  { %185 = vsyncpa [#allocation6], 1 }

</bundles_post_ra>
